<compile_context>
chip_gen: v7x
topology: tpu7x:2x2x1
jax: 0.10.0
libtpu: 0.0.40
codegen_flags: <defaults>
</compile_context>

<pallas_src>
import functools

import jax
import jax.numpy as jnp
from jax.experimental import pallas as pl
from jax.experimental.pallas import tpu as pltpu

# ---------------- LIF neuron constants ----------------
TAU = 2.0
V_TH = 1.0
V_RESET = 0.0
BN_EPS = 1e-5
LANES = 128


def _round_up(n, m):
    return (n + m - 1) // m * m


def _pick_row_tile(n, cap=512):
    """Row tile for the pointwise stages: multiple of 16 (bf16 sublane pack),
    as large as possible up to `cap` (a multiple of 256).  The row count is
    padded up to a multiple of the tile by the caller."""
    if n <= cap:
        return _round_up(max(n, 16), 16)
    return cap


def _pick_band(cout):
    """Row band for the 3x3 accumulator: keep the f32 acc at ~64 KiB so it
    stays in the vreg file instead of spilling to VMEM."""
    rows = (64 * 1024) // (4 * cout)
    rows = max(32, min(512, rows))
    return rows - (rows % 8) if rows % 8 else rows


# =====================================================================
# Shared in-kernel LIF step (charge, fire, hard reset) -- f32 state
# =====================================================================
def _lif_step(z, v_prev):
    v = v_prev + (z - v_prev) * (1.0 / TAU)
    fired = v >= V_TH                      # one compare, reused twice
    spike = fired.astype(jnp.float32)
    v_new = jnp.where(fired, V_RESET, v)
    return spike, v_new


# =====================================================================
# Pallas kernels (each = conv + folded BN + LIF, fused)
# =====================================================================
def conv1x1_bn_lif_kernel(x_ref, w_ref, scale_ref, bias_ref, o_ref, v_ref):
    """Grid (B, Rblocks, T).  x block (1,1,tr,Cin_pad) f32 -> spikes bf16."""
    @pl.when(pl.program_id(2) == 0)
    def _():
        v_ref[...] = jnp.zeros_like(v_ref)

    x = x_ref[0, 0].astype(jnp.bfloat16)           # in-kernel cast, no XLA pass
    z = jnp.dot(x, w_ref[...], preferred_element_type=jnp.float32)
    z = z * scale_ref[...] + bias_ref[...]
    spike, v_new = _lif_step(z, v_ref[...])
    v_ref[...] = v_new
    o_ref[0, 0] = spike.astype(o_ref.dtype)


def conv3x3_bn_lif_kernel(x_ref, w_ref, scale_ref, bias_ref, o_ref, v_ref,
                          *, Lpad, Wp, band):
    """Grid (B, T).  x block = zero-padded, row-major-flattened spatial map.

    3x3 conv (padding=1, stride=1) as nine shifted-window matmuls, accumulated
    in f32 PER ROW BAND so the accumulator stays in registers.  Output rows
    r = i*Wp + j; columns j >= W per row are junk and dropped by the wrapper.
    """
    @pl.when(pl.program_id(1) == 0)
    def _():
        v_ref[...] = jnp.zeros_like(v_ref)

    cout = o_ref.shape[-1]
    scale = scale_ref[...]
    bias = bias_ref[...]
    for r0 in range(0, Lpad, band):
        bh = min(band, Lpad - r0)
        acc = jnp.zeros((bh, cout), jnp.float32)
        # nine taps chained into one accumulator, no interleaved VALU work
        for kh in range(3):
            for kw in range(3):
                s = kh * Wp + kw                      # static tap offset
                xs = x_ref[0, 0, pl.ds(r0 + s, bh), :]
                acc = acc + jnp.dot(xs, w_ref[kh * 3 + kw],
                                    preferred_element_type=jnp.float32)
        z = acc * scale + bias
        spike, v_new = _lif_step(z, v_ref[pl.ds(r0, bh), :])
        v_ref[pl.ds(r0, bh), :] = v_new
        o_ref[0, 0, pl.ds(r0, bh), :] = spike.astype(o_ref.dtype)


def conv1x1_bn_res_lif_kernel(x_ref, id_ref, w_ref, scale_ref, bias_ref,
                              o_ref, v_ref):
    """Grid (B, Rblocks, T).  Fused last stage:
       z = conv1x1(spikes)*scale+bias + identity ; s = LIF(z) ; out = identity + s."""
    @pl.when(pl.program_id(2) == 0)
    def _():
        v_ref[...] = jnp.zeros_like(v_ref)

    ident = id_ref[0, 0]                               # f32
    z = jnp.dot(x_ref[0, 0], w_ref[...], preferred_element_type=jnp.float32)
    z = z * scale_ref[...] + bias_ref[...] + ident
    spike, v_new = _lif_step(z, v_ref[...])
    v_ref[...] = v_new
    o_ref[0, 0] = ident + spike


# =====================================================================
# Compiler params (explicit VMEM limits; safe on v5e / v6e / v7x)
# =====================================================================
_CP_POINTWISE = pltpu.CompilerParams(
    dimension_semantics=("parallel", "parallel", "arbitrary"),
    vmem_limit_bytes=32 * 1024 * 1024)
_CP_CONV3 = pltpu.CompilerParams(
    dimension_semantics=("parallel", "arbitrary"),
    vmem_limit_bytes=48 * 1024 * 1024)


# =====================================================================
# Wrappers
# =====================================================================
def conv1x1_bn_lif(x, w, scale, bias, *, tr):
    """x: (B,T,Lpad,Cin_pad) f32; w: (Cin_pad,Cout_pad) bf16; scale/bias (1,Cout_pad) f32.
    Returns spikes (B,T,Lpad,Cout_pad) bf16."""
    B, T, Lpad, Cin = x.shape
    Cout = w.shape[1]
    grid = (B, Lpad // tr, T)
    return pl.pallas_call(
        conv1x1_bn_lif_kernel,
        out_shape=jax.ShapeDtypeStruct((B, T, Lpad, Cout), jnp.bfloat16),
        grid=grid,
        in_specs=[
            pl.BlockSpec((1, 1, tr, Cin), lambda b, r, t: (b, t, r, 0)),
            pl.BlockSpec((Cin, Cout), lambda b, r, t: (0, 0)),
            pl.BlockSpec((1, Cout), lambda b, r, t: (0, 0)),
            pl.BlockSpec((1, Cout), lambda b, r, t: (0, 0)),
        ],
        out_specs=pl.BlockSpec((1, 1, tr, Cout), lambda b, r, t: (b, t, r, 0)),
        scratch_shapes=[pltpu.VMEM((tr, Cout), jnp.float32)],
        compiler_params=_CP_POINTWISE,
    )(x, w, scale, bias)


def conv3x3_bn_lif(x_padflat, w9, scale, bias, *, Lpad, Wp):
    """x_padflat: (B,T,Npad,Cin_pad) bf16 -- spatially zero-padded (padding=1),
    row-major flattened, with extra bottom rows so all 9 shifted windows are
    in-bounds static slices.  w9: (9,Cin_pad,Cout_pad) bf16 (kh-major).
    Returns spikes (B,T,Lpad,Cout_pad) bf16 (cols >= W per row are junk)."""
    B, T, Npad, Cin = x_padflat.shape
    Cout = w9.shape[-1]
    band = _pick_band(Cout)
    kernel = functools.partial(conv3x3_bn_lif_kernel, Lpad=Lpad, Wp=Wp, band=band)
    return pl.pallas_call(
        kernel,
        out_shape=jax.ShapeDtypeStruct((B, T, Lpad, Cout), jnp.bfloat16),
        grid=(B, T),
        in_specs=[
            pl.BlockSpec((1, 1, Npad, Cin), lambda b, t: (b, t, 0, 0)),
            pl.BlockSpec((9, Cin, Cout), lambda b, t: (0, 0, 0)),
            pl.BlockSpec((1, Cout), lambda b, t: (0, 0)),
            pl.BlockSpec((1, Cout), lambda b, t: (0, 0)),
        ],
        out_specs=pl.BlockSpec((1, 1, Lpad, Cout), lambda b, t: (b, t, 0, 0)),
        scratch_shapes=[pltpu.VMEM((Lpad, Cout), jnp.float32)],
        compiler_params=_CP_CONV3,
    )(x_padflat, w9, scale, bias)
    # TODO(synk): grid-level spatial banding (halo blocks) for v7x 2-TC utilisation.


def conv1x1_bn_res_lif(x, identity, w, scale, bias, *, tr):
    """x: (B,T,Lpad,Cin_pad) bf16 spikes; identity: (B,T,Lpad,Cout_pad) f32.
    Returns out = identity + LIF(conv(x)*scale+bias + identity), f32."""
    B, T, Lpad, Cin = x.shape
    Cout = w.shape[1]
    grid = (B, Lpad // tr, T)
    return pl.pallas_call(
        conv1x1_bn_res_lif_kernel,
        out_shape=jax.ShapeDtypeStruct((B, T, Lpad, Cout), jnp.float32),
        grid=grid,
        in_specs=[
            pl.BlockSpec((1, 1, tr, Cin), lambda b, r, t: (b, t, r, 0)),
            pl.BlockSpec((1, 1, tr, Cout), lambda b, r, t: (b, t, r, 0)),
            pl.BlockSpec((Cin, Cout), lambda b, r, t: (0, 0)),
            pl.BlockSpec((1, Cout), lambda b, r, t: (0, 0)),
            pl.BlockSpec((1, Cout), lambda b, r, t: (0, 0)),
        ],
        out_specs=pl.BlockSpec((1, 1, tr, Cout), lambda b, r, t: (b, t, r, 0)),
        scratch_shapes=[pltpu.VMEM((tr, Cout), jnp.float32)],
        compiler_params=_CP_POINTWISE,
    )(x, identity, w, scale, bias)


# =====================================================================
# Parameter folding helpers (lane-padded, zeros in the padding)
# =====================================================================
def _pad_vec(v, cpad):
    return jnp.zeros((1, cpad), jnp.float32).at[0, : v.shape[0]].set(v)


# =====================================================================
# BottleNeck forward
# =====================================================================
def bottleneck_forward(x, params, stride=1):
    """x: (B, T, C, H, W) float32 (PyTorch convention).  Returns same layout."""
    assert stride == 1, "stride>1 / downsample not supported (downsample=None config)"
    B, T, C, H, W = x.shape
    Cmid = params["w1"].shape[0]          # out_channel
    Cexp = params["w3"].shape[0]          # out_channel * expansion
    assert C == Cexp, "downsample=None requires in_channel == out_channel*expansion"

    Cin_pad = _round_up(C, LANES)
    Cmid_pad = _round_up(Cmid, LANES)
    Cexp_pad = _round_up(Cexp, LANES)
    assert Cin_pad == Cexp_pad

    Wp = W + 2
    Lout = H * Wp                         # shared (H, W+2) row layout
    tr = _pick_row_tile(Lout)
    Lpad = _round_up(Lout, tr)

    # ---- one layout pass: channels-last, 2 junk columns on the right, ----
    # ---- channel + row padding.  Doubles as the stage-3 identity.      ----
    xcl = jnp.transpose(x, (0, 1, 3, 4, 2))                       # (B,T,H,W,C)
    x_l = jnp.pad(xcl, ((0, 0), (0, 0), (0, 0), (0, 2), (0, Cexp_pad - C)))
    x_l = x_l.reshape(B, T, Lout, Cexp_pad)
    if Lpad > Lout:
        x_l = jnp.pad(x_l, ((0, 0), (0, 0), (0, Lpad - Lout), (0, 0)))

    # ---- fold weights for the MXU (bf16, zero lane padding) ----
    w1 = params["w1"][:, :, 0, 0].T                               # (Cin, Cmid)
    w1p = jnp.zeros((Cin_pad, Cmid_pad), jnp.float32
                    ).at[:C, :Cmid].set(w1).astype(jnp.bfloat16)
    w2 = jnp.transpose(params["w2"], (2, 3, 1, 0))                # (3,3,Cmid,Cmid)
    w2p = jnp.zeros((3, 3, Cmid_pad, Cmid_pad), jnp.float32
                    ).at[:, :, :Cmid, :Cmid].set(w2)
    w2p = w2p.reshape(9, Cmid_pad, Cmid_pad).astype(jnp.bfloat16)
    w3 = params["w3"][:, :, 0, 0].T                               # (Cmid, Cexp)
    w3p = jnp.zeros((Cmid_pad, Cexp_pad), jnp.float32
                    ).at[:Cmid, :Cexp].set(w3).astype(jnp.bfloat16)

    s1v = _pad_vec(params["s1"], Cmid_pad); b1v = _pad_vec(params["b1"], Cmid_pad)
    s2v = _pad_vec(params["s2"], Cmid_pad); b2v = _pad_vec(params["b2"], Cmid_pad)
    s3v = _pad_vec(params["s3"], Cexp_pad); b3v = _pad_vec(params["b3"], Cexp_pad)

    # ---- stage 1: conv1x1 + BN + LIF (fused) ----
    s1 = conv1x1_bn_lif(x_l, w1p, s1v, b1v, tr=tr)        # (B,T,Lpad,Cmid_pad) bf16

    # ---- single pad pass between stages 1 and 2: true zero spatial padding
    #      for the 3x3 conv; junk cols/rows of s1 are dropped here and the
    #      tail rows for the shifted-window slices are folded into the pad ----
    eh = -(-(Lpad - Lout + 2) // Wp)                      # extra bottom rows
    Npad = (H + 2 + eh) * Wp
    s1_img = s1[:, :, :Lout, :].reshape(B, T, H, Wp, Cmid_pad)[:, :, :, :W, :]
    s1_flat = jnp.pad(s1_img, ((0, 0), (0, 0), (1, 1 + eh), (1, 1), (0, 0))
                      ).reshape(B, T, Npad, Cmid_pad)

    # ---- stage 2: conv3x3 (padding=1) + BN + LIF (fused, banded acc) ----
    s2 = conv3x3_bn_lif(s1_flat, w2p, s2v, b2v, Lpad=Lpad, Wp=Wp)

    # ---- stage 3: conv1x1 + BN + residual + LIF + final add (fused) ----
    # Consumes the padded row layout directly (no compaction pass); identity
    # is the shared x_l, which is zero at the junk columns/rows/channels.
    out = conv1x1_bn_res_lif(s2, x_l, w3p, s3v, b3v, tr=tr)       # f32

    out = out[:, :, :Lout, :].reshape(B, T, H, Wp, Cexp_pad)[:, :, :, :W, :Cexp]
    return jnp.transpose(out, (0, 1, 4, 2, 3))            # back to (B, T, C, H, W)


# =====================================================================
# Deterministic parameter init (shapes implied by the module __init__)
# =====================================================================
def make_bn_fold(key, c):
    k1, k2, k3, k4 = jax.random.split(key, 4)
    gamma = 1.0 + 0.1 * jax.random.normal(k1, (c,), jnp.float32)
    beta = 0.1 * jax.random.normal(k2, (c,), jnp.float32)
    mean = 0.1 * jax.random.normal(k3, (c,), jnp.float32)
    var = 0.5 + jnp.abs(jax.random.normal(k4, (c,), jnp.float32))
    scale = gamma / jnp.sqrt(var + BN_EPS)
    bias = beta - mean * scale
    return scale, bias


def make_params(key, in_ch, out_ch, expansion=4):
    ks = jax.random.split(key, 6)
    w1 = 0.3 * jax.random.normal(ks[0], (out_ch, in_ch, 1, 1), jnp.float32)
    w2 = 0.3 * jax.random.normal(ks[1], (out_ch, out_ch, 3, 3), jnp.float32)
    w3 = 0.3 * jax.random.normal(ks[2], (out_ch * expansion, out_ch, 1, 1), jnp.float32)
    s1, b1 = make_bn_fold(ks[3], out_ch)
    s2, b2 = make_bn_fold(ks[4], out_ch)
    s3, b3 = make_bn_fold(ks[5], out_ch * expansion)
    return dict(w1=w1, s1=s1, b1=b1, w2=w2, s2=s2, b2=b2, w3=w3, s3=s3, b3=b3)


# =====================================================================
if __name__ == "__main__":
    B, T, H, W = 2, 4, 8, 8
    out_ch = 4
    in_ch = out_ch * 4  # == out_channel * expansion -> downsample=None, stride=1

    key = jax.random.PRNGKey(0)
    kx, kp = jax.random.split(key)
    x = jax.random.normal(kx, (B, T, in_ch, H, W), jnp.float32)
    params = make_params(kp, in_ch, out_ch)

    out = bottleneck_forward(x, params, stride=1)
    out = jax.block_until_ready(out)

    assert out.shape == (B, T, in_ch, H, W), out.shape
    assert bool(jnp.all(jnp.isfinite(out)))
    print("KERNEL_OK")
</pallas_src>

<mosaic_0001>
module attributes {stable_mosaic.version = 11 : i64} {
  func.func @conv1x1_bn_lif_kernel(%arg0: i32, %arg1: i32, %arg2: i32, %arg3: memref<1x1x80x128xf32, #tpu.memory_space<vmem>>, %arg4: memref<128x128xbf16, #tpu.memory_space<vmem>>, %arg5: memref<1x128xf32, #tpu.memory_space<vmem>>, %arg6: memref<1x128xf32, #tpu.memory_space<vmem>>, %arg7: memref<1x1x80x128xbf16, #tpu.memory_space<vmem>>, %arg8: memref<80x128xf32, #tpu.memory_space<vmem>>) attributes {dimension_semantics = [#tpu.dimension_semantics<parallel>, #tpu.dimension_semantics<parallel>, #tpu.dimension_semantics<arbitrary>], iteration_bounds = array<i64: 2, 1, 4>, scalar_prefetch = 0 : i64, scratch_operands = 1 : i64, tpu.core_type = #tpu.core_type<tc>, window_params = [{transform_indices = @transform_0, window_bounds = array<i64: 1, 1, 80, 128>}, {pipeline_mode = #tpu.pipeline_mode<synchronous>, transform_indices = @transform_1, window_bounds = array<i64: 128, 128>}, {pipeline_mode = #tpu.pipeline_mode<synchronous>, transform_indices = @transform_2, window_bounds = array<i64: 1, 128>}, {pipeline_mode = #tpu.pipeline_mode<synchronous>, transform_indices = @transform_3, window_bounds = array<i64: 1, 128>}, {transform_indices = @transform_4, window_bounds = array<i64: 1, 1, 80, 128>}]} {
    %c0_i32 = arith.constant 0 : i32
    %0 = arith.cmpi eq, %arg2, %c0_i32 : i32
    %1 = arith.extui %0 : i1 to i32
    %c0_i32_0 = arith.constant 0 : i32
    %2 = arith.cmpi ne, %1, %c0_i32_0 : i32
    scf.if %2 {
      %cst_21 = arith.constant 0.000000e+00 : f32
      %30 = vector.broadcast %cst_21 : f32 to vector<80x128xf32>
      %c0_22 = arith.constant 0 : index
      %c0_23 = arith.constant 0 : index
      %31 = vector.load %arg8[%c0_22, %c0_23] : memref<80x128xf32, #tpu.memory_space<vmem>>, vector<80x128xf32>
      tpu.vector_store %arg8[%c0_22, %c0_23], %30 {strides = array<i32>} : memref<80x128xf32, #tpu.memory_space<vmem>>, vector<80x128xf32>,
    } else {
    }
    %c0 = arith.constant 0 : index
    %c0_1 = arith.constant 0 : index
    %c0_2 = arith.constant 0 : index
    %c0_3 = arith.constant 0 : index
    %3 = vector.load %arg3[%c0, %c0_1, %c0_2, %c0_3] : memref<1x1x80x128xf32, #tpu.memory_space<vmem>>, vector<1x1x80x128xf32>
    %4 = vector.shape_cast %3 : vector<1x1x80x128xf32> to vector<80x128xf32>
    %5 = arith.truncf %4 : vector<80x128xf32> to vector<80x128xbf16>
    %c0_4 = arith.constant 0 : index
    %c0_5 = arith.constant 0 : index
    %6 = vector.load %arg4[%c0_4, %c0_5] : memref<128x128xbf16, #tpu.memory_space<vmem>>, vector<128x128xbf16>
    %cst = arith.constant dense<0.000000e+00> : vector<80x128xf32>
    %7 = tpu.matmul %5, %6, %cst {dimension_numbers = #tpu.dot_dimension_numbers<[1], [0], [0], [1], [0, 0, 1, 1], [], []>} : vector<80x128xbf16>, vector<128x128xbf16>, vector<80x128xf32> -> vector<80x128xf32>
    %c0_6 = arith.constant 0 : index
    %c0_7 = arith.constant 0 : index
    %8 = vector.load %arg5[%c0_6, %c0_7] : memref<1x128xf32, #tpu.memory_space<vmem>>, vector<1x128xf32>
    %9 = vector.broadcast %8 : vector<1x128xf32> to vector<80x128xf32>
    %10 = arith.mulf %7, %9 : vector<80x128xf32>
    %c0_8 = arith.constant 0 : index
    %c0_9 = arith.constant 0 : index
    %11 = vector.load %arg6[%c0_8, %c0_9] : memref<1x128xf32, #tpu.memory_space<vmem>>, vector<1x128xf32>
    %12 = vector.broadcast %11 : vector<1x128xf32> to vector<80x128xf32>
    %13 = arith.addf %10, %12 : vector<80x128xf32>
    %c0_10 = arith.constant 0 : index
    %c0_11 = arith.constant 0 : index
    %14 = vector.load %arg8[%c0_10, %c0_11] : memref<80x128xf32, #tpu.memory_space<vmem>>, vector<80x128xf32>
    %15 = arith.subf %13, %14 : vector<80x128xf32>
    %cst_12 = arith.constant 5.000000e-01 : f32
    %16 = vector.broadcast %cst_12 : f32 to vector<80x128xf32>
    %17 = arith.mulf %15, %16 : vector<80x128xf32>
    %18 = arith.addf %14, %17 : vector<80x128xf32>
    %cst_13 = arith.constant 1.000000e+00 : f32
    %19 = vector.broadcast %cst_13 : f32 to vector<80x128xf32>
    %20 = arith.cmpf oge, %18, %19 : vector<80x128xf32>
    %21 = arith.extui %20 : vector<80x128xi1> to vector<80x128xi32>
    %22 = arith.sitofp %21 : vector<80x128xi32> to vector<80x128xf32>
    %cst_14 = arith.constant 0.000000e+00 : f32
    %23 = vector.broadcast %cst_14 : f32 to vector<80x128xf32>
    %24 = arith.select %20, %23, %18 : vector<80x128xi1>, vector<80x128xf32>
    %c0_15 = arith.constant 0 : index
    %c0_16 = arith.constant 0 : index
    %25 = vector.load %arg8[%c0_15, %c0_16] : memref<80x128xf32, #tpu.memory_space<vmem>>, vector<80x128xf32>
    tpu.vector_store %arg8[%c0_15, %c0_16], %24 {strides = array<i32>} : memref<80x128xf32, #tpu.memory_space<vmem>>, vector<80x128xf32>,
    %26 = arith.truncf %22 : vector<80x128xf32> to vector<80x128xbf16>
    %c0_17 = arith.constant 0 : index
    %c0_18 = arith.constant 0 : index
    %c0_19 = arith.constant 0 : index
    %c0_20 = arith.constant 0 : index
    %27 = vector.load %arg7[%c0_17, %c0_18, %c0_19, %c0_20] : memref<1x1x80x128xbf16, #tpu.memory_space<vmem>>, vector<1x1x80x128xbf16>
    %28 = vector.shape_cast %27 : vector<1x1x80x128xbf16> to vector<80x128xbf16>
    %29 = vector.shape_cast %26 : vector<80x128xbf16> to vector<1x1x80x128xbf16>
    tpu.vector_store %arg7[%c0_17, %c0_18, %c0_19, %c0_20], %29 {strides = array<i32>} : memref<1x1x80x128xbf16, #tpu.memory_space<vmem>>, vector<1x1x80x128xbf16>,
    return
  }
  func.func @transform_0(%arg0: i32, %arg1: i32, %arg2: i32) -> (i32, i32, i32, i32) {
    %c0_i32 = arith.constant 0 : i32
    %c0_i32_0 = arith.constant 0 : i32
    return %arg0, %arg2, %arg1, %c0_i32 : i32, i32, i32, i32
  }
  func.func @transform_1(%arg0: i32, %arg1: i32, %arg2: i32) -> (i32, i32) {
    %c0_i32 = arith.constant 0 : i32
    %c0_i32_0 = arith.constant 0 : i32
    %c0_i32_1 = arith.constant 0 : i32
    return %c0_i32, %c0_i32_0 : i32, i32
  }
  func.func @transform_2(%arg0: i32, %arg1: i32, %arg2: i32) -> (i32, i32) {
    %c0_i32 = arith.constant 0 : i32
    %c0_i32_0 = arith.constant 0 : i32
    %c0_i32_1 = arith.constant 0 : i32
    return %c0_i32, %c0_i32_0 : i32, i32
  }
  func.func @transform_3(%arg0: i32, %arg1: i32, %arg2: i32) -> (i32, i32) {
    %c0_i32 = arith.constant 0 : i32
    %c0_i32_0 = arith.constant 0 : i32
    %c0_i32_1 = arith.constant 0 : i32
    return %c0_i32, %c0_i32_0 : i32, i32
  }
  func.func @transform_4(%arg0: i32, %arg1: i32, %arg2: i32) -> (i32, i32, i32, i32) {
    %c0_i32 = arith.constant 0 : i32
    %c0_i32_0 = arith.constant 0 : i32
    return %arg0, %arg2, %arg1, %c0_i32 : i32, i32, i32, i32
  }
}

</mosaic_0001>

<bundles_post_ra>
// kernel: tpu_custom_call.1
= control target key start
LH: loop header
LB: loop body
LE: loop exit
PB: predicated region body
PF: predicated region fallthrough
CT: control target
= control target key end

     0   :  { %s1501_s0 = inlined_call_operand.hbm [shape: f32[2,4,80,128], index: 0, kind: input, shape index: {}]   ;;  %s1502_s1 = inlined_call_operand.hbm [shape: bf16[128,128], index: 1, kind: input, shape index: {}]   ;;  %s1503_s2 = inlined_call_operand.vmem [shape: f32[1,128], index: 2, kind: input, shape index: {}]   ;;  %s1504_s3 = inlined_call_operand.vmem [shape: f32[1,128], index: 3, kind: input, shape index: {}]   ;;  %s1505_s4 = inlined_call_operand.hbm [shape: bf16[2,4,80,128], index: 4, kind: output, shape index: {}]  }
   0x1   :  { %1514 = sst [smem:[#allocation16_spill]] %s1502_s1 }
   0x2   :  { %9 = vsyncpa [#allocation4], 0 }
   0x3   :  { %11 = vsyncpa [#allocation4 + $0x1], 0 }
   0x4   :  { %12 = vsyncpa [#allocation7], 0 }
   0x5   :  { %13 = vsyncpa [#allocation5], 0 }
   0x6   :  { %15 = vsyncpa [#allocation5 + $0x1], 0  ;;  %s1178_s15 = smov 0   ;;  %s1180_s16 = smov 0  }
   0x7   :  { %s1182_s17 = smov 0   ;;  %s1184_s18 = smov 0  }
   0x8   :  { %s1186_s19 = smov 0   ;;  %s1188_s20 = smov 0  }
   0x9   :  { %s1190_s21 = smov 0   ;;  %s1192_s22 = smov 0  }
   0xa LB: > { %1515 = sst [smem:[#allocation12_spill]] %s1131_s20  ;;  %s730_s23 = sadd.s32 4294967295, %s1139_s22   ;;  %s1139_s22 = sphi %s1192_s22, %s21_s22   ;;  %s1135_s21 = sphi %s1190_s21, %s1541_s21   ;;  %s1131_s20 = sphi %s1188_s20, %s1535_s20   ;;  %s1127_s19 = sphi %s1186_s19, %s1540_s19   ;;  %s1123_s18 = sphi %s1184_s18, %s1534_s18   ;;  %s1119_s17 = sphi %s1182_s17, %s1539_s17   ;;  %s1115_s16 = sphi %s1180_s16, %s1538_s16   ;;  %s1111_s15 = sphi %s1178_s15, %s1537_s15  }
   0xb   : > { %s731_s24 = sadd.s32 4294967294, %s1139_s22   ;;  %p64_p0 = scmp.ne.s32.totalorder %s1115_s16, %s1111_s15 }
   0xc   : > { %p1222_p1 = scmp.eq.s32.totalorder %s730_s23, 0  ;;  %p1226_p2 = scmp.eq.s32.totalorder %s730_s23, 7 }
   0xd   : > { %p161_p3 = scmp.eq.s32.totalorder %s731_s24, 7  ;;  %p732_p5 = scmp.ge.s32.totalorder %s1139_s22, 1 }
   0xe   : > { %s1516_s25 = scalar_select %p1222_p1, 1, 0 }
   0xf   : > { %s1517_s26 = scalar_select %p1226_p2, 1, 0 }
  0x10   : > { %p1232_p4 = por %p1222_p1, %p64_p0  ;;  %p1237_p6 = por %p161_p3, %p64_p0 }
  0x11   : > { %p168_p7 = scmp.lt.s32.totalorder %s1139_s22, 9  ;;  %s1141_s30 = smov [#allocation6]  }
  0x12   : > { %s1518_s27 = scalar_select %p1232_p4, 1, 0 }
  0x13   : > { %s1519_s28 = scalar_select %p1237_p6, 1, 0 }
  0x14   : > { %p1242_p8 = pnand %p732_p5, %p168_p7  ;;  %s180_s5 = sshll.u32 %s1141_s30, 4  ;;  %s181_s5 = int_to_ptr.vmem [resolvable:$true] %s180_s5 }
  0x15   : > { %1520 = sst [smem:[#allocation13_spill]] %s1519_s28  ;;  %s1523_s1 = sld [smem:[#allocation16_spill]] }
  0x16   : > { %s1521_s29 = scalar_select %p1242_p8, 1, 0 }
  0x17   : > { %p881_p9 = pneg %p1242_p8 }
  0x19   : > { %p1250_p10 = pnand %p881_p9, %p1222_p1 }
  0x1b   : > { %s979_s9 = scalar_lea.hbm %s1523_s1, 1024  ;;  %p981_p12 = pneg %p1250_p10 }
  0x1c   : > { %p980_p11 = scmp.ne.s32.totalorder %s1523_s1, %s979_s9  ;;  %p986_p3 = scmp.lt.u32.totalorder %s979_s9, %s1523_s1 }
  0x1e   : > { %p982_p13 = pnand %p981_p12, %p980_p11 }
  0x20   : > { %p983_p0 = pneg %p982_p13 }
  0x22   : > { %p988_p5 = pnand %p986_p3, %p983_p0 }
  0x24   : > { %991 = shalt.err (!%p988_p5)
}
  0x25   : > { %s992_s14 = scalar_lea.vmem %s181_s5, 1024  ;;  %p1000_p1 = scmp.lt.s32.totalorder %s181_s5, %s181_s5 }
  0x26   : > { %p993_p7 = scmp.ne.s32.totalorder %s181_s5, %s992_s14  ;;  %p1001_p4 = scmp.lt.s32.totalorder %s992_s14, %s992_s14 }
  0x28   : > { %p995_p9 = pnand %p993_p7, %p981_p12  ;;  %p1002_p8 = por %p1001_p4, %p1000_p1 }
  0x2a   : > { %p996_p6 = pneg %p995_p9 }
  0x2c   : > { %p1003_p2 = pnand %p1002_p8, %p996_p6 }
  0x2e   : > { %1006 = shalt.err (!%p1003_p2)
}
  0x2f   : > { %s1142_s23 = smov 64   ;;  %s1143_s24 = smov 4  }
  0x30   : > { %884 = dma.hbm_to_vmem [thread:$0]  (!%p1250_p10), %s1523_s1, 1024, %s181_s5, [#allocation7], %s1142_s23, %s1142_s23, %s1143_s24  }
  0x31   : > { %s33_s8 = sadd.s32 1, %s1131_s20  ;;  %s40_s9 = sadd.s32 1, %s1135_s21 }
  0x32   : > { %p34_p1 = scmp.ge.s32.totalorder %s33_s8, 4  ;;  %s51_s10 = sadd.s32 1, %s1119_s17 }
  0x33   : > { %p58_p2 = scmp.ne.s32.totalorder %s1119_s17, %s1115_s16  ;;  %p59_p4 = scmp.eq.s32.totalorder %s1139_s22, 0 }
  0x34   : > { %s1543_s8 = smov (%p34_p1, %s33_s8), 0  ;;  %s1545_s9 = smov (!%p34_p1, %s40_s9), %s1135_s21 }
  0x35   : > { %1524 = sst [smem:[#allocation14_spill]] %s1543_s8  ;;  %s45_s11 = ssub.s32 %s1131_s20, %s1543_s8 }
  0x36   : > { %p42_p6 = scmp.ge.s32.totalorder %s1545_s9, 2  ;;  %p1525_p8 = scmp.ne.s32.totalorder %s1517_s26, 0 }
  0x37   : > { %p60_p10 = por %p59_p4, %p58_p2  ;;  %p894_p12 = scmp.lt.s32.totalorder %s1139_s22, 8 }
  0x38   : > { %p1283_p11 = por %p1525_p8, %p58_p2  ;;  %s1547_s9 = smov (%p42_p6, %s1545_s9), 0 }
  0x39   : > { %1527 = sst [smem:[#allocation15_spill]] %s1547_s9  ;;  %s200_s5 = sand.u32 1, %s1119_s17  }
  0x3a   : > { %s867_s12 = smul.u32 10, %s1131_s20  ;;  %s44_s13 = ssub.s32 %s1135_s21, %s1547_s9 }
  0x3b   : > { %s46_s14 = sor.u32 %s45_s11, %s44_s13  ;;  %s866_s23 = smul.u32 80, %s200_s5 }
  0x3c   : > { %p49_p13 = scmp.eq.s32.totalorder %s46_s14, 0  ;;  %s868_s24 = smul.u32 40, %s1135_s21 }
  0x3d   : > { %p1295_p0 = pnand %p894_p12, %p60_p10  ;;  %s204_s1 = scalar_lea.vmem [#allocation3], %s866_s23 }
  0x3e   : > { %s1300_s26 = scalar_select %p49_p13, %s1119_s17, %s51_s10  }
  0x3f   : > { %s212_s7 = sadd.s32 %s868_s24, %s867_s12  ;;  %s215_s8 = sshll.u32 %s204_s1, 4  ;;  %s1302_s8 = int_to_ptr.vmem [resolvable:$true] %s215_s8 }
  0x40   : > { %s735_s28 = sshll.u32 %s212_s7, 7  ;;  %s1309_s13 = scalar_lea.sflag [#allocation4], %s200_s5 }
  0x41   : > { %s1307_s11 = scalar_lea.hbm %s1501_s0, %s735_s28  ;;  %p1009_p5 = pneg %p1295_p0 }
  0x42   : > { %s1007_s14 = scalar_lea.hbm %s1307_s11, 1280  ;;  %s1012_s20 = scalar_lea.hbm %s1501_s0, 10240 }
  0x43   : > { %p1008_p3 = scmp.ne.s32.totalorder %s1307_s11, %s1007_s14  ;;  %p1013_p1 = scmp.lt.u32.totalorder %s1307_s11, %s1501_s0 }
  0x44   : > { %p1014_p2 = scmp.lt.u32.totalorder %s1012_s20, %s1007_s14  ;;  %p1016_p6 = scmp.lt.u32.totalorder %s1007_s14, %s1307_s11 }
  0x45   : > { %p1010_p7 = pnand %p1009_p5, %p1008_p3 }
  0x46   : > { %p1015_p4 = por %p1014_p2, %p1013_p1 }
  0x47   : > { %p1011_p9 = pneg %p1010_p7 }
  0x48   : > { %p1017_p8 = por %p1016_p6, %p1015_p4 }
  0x4a   : > { %p1018_p10 = pnand %p1017_p8, %p1011_p9 }
  0x4c   : > { %1021 = shalt.err (!%p1018_p10)
}
  0x4d   : > { %s1022_s5 = scalar_lea.vmem %s1302_s8, 1280  ;;  %s1144_s12 = smov [#allocation3]  }
  0x4e   : > { %p1023_p12 = scmp.ne.s32.totalorder %s1302_s8, %s1022_s5  ;;  %s1027_s23 = sshll.u32 %s1144_s12, 4  ;;  %s1028_s23 = int_to_ptr.vmem [resolvable:$false] %s1027_s23 }
  0x4f   : > { %s1029_s24 = scalar_lea.vmem %s1028_s23, 2560  ;;  %p1030_p7 = scmp.lt.s32.totalorder %s1302_s8, %s1028_s23 }
  0x50   : > { %p1025_p13 = pnand %p1023_p12, %p1009_p5  ;;  %p1031_p1 = scmp.lt.s32.totalorder %s1029_s24, %s1022_s5 }
  0x52   : > { %p1026_p3 = pneg %p1025_p13  ;;  %p1032_p2 = por %p1031_p1, %p1030_p7 }
  0x54   : > { %p1033_p4 = pnand %p1032_p2, %p1026_p3 }
  0x56   : > { %1036 = shalt.err (!%p1033_p4)
}
  0x57   : > { %s1145_s7 = smov 128   ;;  %s1146_s14 = smov 8  }
  0x58   : > { %888 = dma.hbm_to_vmem [thread:$0]  (!%p1295_p0), %s1307_s11, 1280, %s1302_s8, %s1309_s13, %s1145_s7, %s1145_s7, %s1146_s14  }
  0x59   : > { %p1529_p5 = scmp.ne.s32.totalorder %s1521_s29, 0 }
  0x5a   : > { %s1340_s1 = sand.u32 (!%p1529_p5), 1, %s1115_s16   ;;  %p1530_p9 = scmp.ne.s32.totalorder (!%p1529_p5), %s1518_s27, 0 }
  0x5b   : > { %227 = sbr.rel (%p1529_p5) target bundleno = 404 (0x194), region = 36  ;;  %s230_s20 = scalar_lea.sflag (!%p1529_p5), [#allocation4], %s1340_s1 }
  0x5c   : > { %s869_s10 = smul.u32 (!%p1529_p5), 80, %s1340_s1 }
  0x5e   : > { %s1344_s28 = scalar_lea.vmem (!%p1529_p5), [#allocation3], %s869_s10 }
  0x62   : > { %1098 = dma.done.wait (%p1530_p9), %s230_s20, 1280  }
  0x63   : > { %1100 = vsyncadd (%p1530_p9), %s230_s20, 4294966016  ;;  %p1531_p0 = scmp.ne.s32.totalorder %s1516_s25, 0 }
  0x65   : > { %1102 = dma.done.wait (%p1531_p0), [#allocation7], 1024  }
  0x66   : > { %1104 = vsyncadd (%p1531_p0), [#allocation7], 4294966272  ;;  %s870_s29 = smul.u32 40, %s1340_s1  ;;  %p738_p6 = scmp.ne.s32.totalorder %s1123_s18, 0 }
  0x67   : > { %v1147_v0 = vmov (!%p738_p6), 0.0  }
  0x68   : > { %s1355_s8 = scalar_lea.vmem [#allocation8], %s870_s29  ;;  %268 = sbr.rel (%p738_p6) target bundleno = 111 (0x6f), region = 48  ;;  %269 = vst [vmem:[#allocation2] sm:$0xff] (!%p738_p6), %v1147_v0  ;;  %270 = vst [vmem:[#allocation2 + $0x8] sm:$0xff] (!%p738_p6), %v1147_v0 }
  0x69   : > { %271 = vst [vmem:[#allocation2 + $0x10] sm:$0xff] (!%p738_p6), %v1147_v0  ;;  %272 = vst [vmem:[#allocation2 + $0x18] sm:$0xff] (!%p738_p6), %v1147_v0 }
  0x6a   : > { %273 = vst [vmem:[#allocation2 + $0x20] sm:$0xff] (!%p738_p6), %v1147_v0  ;;  %274 = vst [vmem:[#allocation2 + $0x28] sm:$0xff] (!%p738_p6), %v1147_v0 }
  0x6b   : > { %275 = vst [vmem:[#allocation2 + $0x30] sm:$0xff] (!%p738_p6), %v1147_v0  ;;  %276 = vst [vmem:[#allocation2 + $0x38] sm:$0xff] (!%p738_p6), %v1147_v0 }
  0x6c   : > { %277 = vst [vmem:[#allocation2 + $0x40] sm:$0xff] (!%p738_p6), %v1147_v0  ;;  %278 = vst [vmem:[#allocation2 + $0x48] sm:$0xff] (!%p738_p6), %v1147_v0 }
  0x6f PF: > { %v971_v1 = vld [vmem:[#allocation6] sm:$0xff]   ;;  %v1148_v2 = vmov 0.0   ;;  %v972_v3 = vld [vmem:[#allocation6 + $0x8] sm:$0xff]   ;;  %vm1149_vm0 = vmmov 0   ;;  %v973_v4 = vld [vmem:[#allocation6 + $0x10] sm:$0xff]   ;;  %s871_s13 = smul.u32 10, %s1123_s18 }
  0x70   : > { %814 = vmatprep.subr.bf16.mxu0 %v1148_v2  ;;  %850 = vmatprep.subr.bf16.mxu1 %v1148_v2  ;;  %v974_v5 = vld [vmem:[#allocation6 + $0x18] sm:$0xff]   ;;  %v975_v6 = vld [vmem:[#allocation6 + $0x20] sm:$0xff]   ;;  %v976_v7 = vld [vmem:[#allocation6 + $0x28] sm:$0xff]   ;;  %s872_s9 = smul.u32 40, %s1127_s19  ;;  %s623_s5 = sshll.u32 %s1355_s8, 4  ;;  %s1446_s5 = int_to_ptr.vmem [resolvable:$true] %s623_s5 }
  0x71   : > { %815 = vmatpush3.bf16.msra.mxu0 %v971_v1  ;;  %858 = vmatpush3.bf16.msra.mxu1 %v971_v1  ;;  %v977_v8 = vld [vmem:[#allocation6 + $0x30] sm:$0xff]   ;;  %v978_v9 = vld [vmem:[#allocation6 + $0x38] sm:$0xff]   ;;  %s606_s7 = scalar_lea.sflag [#allocation5], %s1340_s1  ;;  %s1037_s14 = scalar_lea.vmem %s1446_s5, 640 }
  0x72   : > { %816 = vmatprep.subr.bf16.mxu0 %v1148_v2  ;;  %851 = vmatprep.subr.bf16.mxu1 %v1148_v2  ;;  %v279_v10 = vld [vmem:[%s1344_s28] sm:$0xff]  ;;  %v280_v11 = vld [vmem:[%s1344_s28 + $0x8] sm:$0xff]  ;;  %v285_v12 = vld [vmem:[%s1344_s28 + $0x30] sm:$0xff]  ;;  %s620_s18 = sadd.s32 %s872_s9, %s871_s13  ;;  %p1038_p8 = scmp.ne.s32.totalorder %s1446_s5, %s1037_s14 }
  0x73   : > { %830 = vmatprep.mubr.msk.bf16.mxu0 %vm1149_vm0, %v1148_v2  ;;  %842 = vmatprep.mubr.msk.bf16.mxu1 %vm1149_vm0, %v1148_v2  ;;  %v286_v13 = vld [vmem:[%s1344_s28 + $0x38] sm:$0xff]  ;;  %v289_v14 = vpack.c.bf16 %v280_v11, %v279_v10  ;;  %v281_v16 = vld [vmem:[%s1344_s28 + $0x10] sm:$0xff]  ;;  %v287_v18 = vld [vmem:[%s1344_s28 + $0x40] sm:$0xff]  ;;  %s769_s19 = sshll.u32 %s620_s18, 6  ;;  %s1150_s10 = smov [#allocation8]  }
  0x74   : > { %v292_v15 = vpack.c.bf16 %v286_v13, %v285_v12  ;;  %v282_v17 = vld [vmem:[%s1344_s28 + $0x18] sm:$0xff]  ;;  %v288_v19 = vld [vmem:[%s1344_s28 + $0x48] sm:$0xff]  ;;  %v283_v22 = vld [vmem:[%s1344_s28 + $0x20] sm:$0xff]  ;;  %s1444_s24 = scalar_lea.hbm %s1505_s4, %s769_s19  ;;  %p1039_p10 = pnand %p1038_p8, %p1283_p11 }
  0x75   : > { %817 = vmatpush3.bf16.msra.mxu0 %v972_v3  ;;  %859 = vmatpush3.bf16.msra.mxu1 %v972_v3  ;;  %v290_v20 = vpack.c.bf16 %v282_v17, %v281_v16  ;;  %v293_v21 = vpack.c.bf16 %v288_v19, %v287_v18  ;;  %v284_v23 = vld [vmem:[%s1344_s28 + $0x28] sm:$0xff]  ;;  %v1397_v25 = vld [vmem:[%s1503_s2] ss:$0 sm:$0xff]  ;;  %v471_v35 = vld [vmem:[#allocation2 + $0x30] sm:$0xff]  ;;  %s1041_s20 = sshll.u32 %s1150_s10, 4  ;;  %s1042_s20 = int_to_ptr.vmem [resolvable:$false] %s1041_s20 }
  0x76   : > { %818 = vmatprep.subr.bf16.mxu0 %v1148_v2  ;;  %852 = vmatprep.subr.bf16.mxu1 %v1148_v2  ;;  %v291_v24 = vpack.c.bf16 %v284_v23, %v283_v22  ;;  %v1402_v27 = vld [vmem:[%s1504_s3] ss:$0 sm:$0xff]  ;;  %v466_v43 = vld [vmem:[#allocation2 + $0x8] sm:$0xff]  ;;  %v472_v44 = vld [vmem:[#allocation2 + $0x38] sm:$0xff]  ;;  %p1040_p12 = pneg %p1039_p10  ;;  %s1043_s28 = scalar_lea.vmem %s1042_s20, 1280 }
  0x77   : > { %v465_v33 = vld [vmem:[#allocation2] sm:$0xff]  ;;  %v467_v10 = vld [vmem:[#allocation2 + $0x10] sm:$0xff]  ;;  %v468_v17 = vld [vmem:[#allocation2 + $0x18] sm:$0xff]  ;;  %p1044_p13 = scmp.lt.s32.totalorder %s1446_s5, %s1042_s20  ;;  %p1045_p3 = scmp.lt.s32.totalorder %s1043_s28, %s1037_s14 }
  0x78   : > { %v473_v22 = vld [vmem:[#allocation2 + $0x40] sm:$0xff] }
  0x79   : > { %819 = vmatpush3.bf16.msra.mxu0 %v973_v4  ;;  %860 = vmatpush3.bf16.msra.mxu1 %v973_v4  ;;  %p1046_p7 = por %p1045_p3, %p1044_p13 }
  0x7a   : > { %820 = vmatprep.subr.bf16.mxu0 %v1148_v2  ;;  %853 = vmatprep.subr.bf16.mxu1 %v1148_v2 }
  0x7b   : > { %p1047_p1 = pnand %p1046_p7, %p1040_p12 }
  0x7d   : > { %821 = vmatpush3.bf16.msra.mxu0 %v974_v5  ;;  %861 = vmatpush3.bf16.msra.mxu1 %v974_v5 }
  0x7e   : > { %822 = vmatprep.subr.bf16.mxu0 %v1148_v2  ;;  %854 = vmatprep.subr.bf16.mxu1 %v1148_v2 }
  0x81   : > { %823 = vmatpush3.bf16.msra.mxu0 %v975_v6  ;;  %862 = vmatpush3.bf16.msra.mxu1 %v975_v6 }
  0x82   : > { %824 = vmatprep.subr.bf16.mxu0 %v1148_v2  ;;  %855 = vmatprep.subr.bf16.mxu1 %v1148_v2 }
  0x85   : > { %825 = vmatpush3.bf16.msra.mxu0 %v976_v7  ;;  %863 = vmatpush3.bf16.msra.mxu1 %v976_v7 }
  0x86   : > { %826 = vmatprep.subr.bf16.mxu0 %v1148_v2  ;;  %856 = vmatprep.subr.bf16.mxu1 %v1148_v2 }
  0x89   : > { %827 = vmatpush3.bf16.msra.mxu0 %v977_v8  ;;  %864 = vmatpush3.bf16.msra.mxu1 %v977_v8 }
  0x8a   : > { %828 = vmatprep.subr.bf16.mxu0 %v1148_v2  ;;  %857 = vmatprep.subr.bf16.mxu1 %v1148_v2 }
  0x8d   : > { %829 = vmatpush3.bf16.msra.mxu0 %v978_v9  ;;  %865 = vmatpush3.bf16.msra.mxu1 %v978_v9 }
  0x90   : > { %831 = vmatmul.mubr.bf16.vlgmr.msra.gmra.mrb[0].mxu0 %v289_v14  ;;  %843 = vmatmul.mubr.bf16.vlgmr.msra.gmra.mrb[0].mxu1 %v292_v15 }
  0x91   : > { %834 = vmatprep.mubr.msk.bf16.mxu0 %vm1149_vm0, %v1148_v2  ;;  %846 = vmatprep.mubr.msk.bf16.mxu1 %vm1149_vm0, %v1148_v2 }
  0x98   : > { %835 = vmatmul.mubr.bf16.gmra.mrb[4].mxu0 %v290_v20  ;;  %847 = vmatmul.mubr.bf16.gmra.mrb[4].mxu1 %v293_v21 }
  0x99   : > { %838 = vmatprep.mubr.msk.bf16.mxu0 %vm1149_vm0, %v1148_v2 }
  0xa0   : > { %839 = vmatmul.mubr.bf16.gmra.mrb[8].mxu0 %v291_v24 }
 0x163   : > { %v392_v26 = vpop.f32.mrb[0].mxu0  ;;  %v416_v28 = vpop.f32.mrb[0].mxu1 }
 0x164   : > { %v438_v29 = vmul.f32 %v1397_v25, %v392_v26  ;;  %v832_v30 = vpop.f32.mrb[1].mxu0  ;;  %v444_v31 = vmul.f32 %v1397_v25, %v416_v28  ;;  %v844_v32 = vpop.f32.mrb[1].mxu1 }
 0x165   : > { %v395_v34 = vpop.f32.mrb[2].mxu0  ;;  %v419_v36 = vpop.f32.mrb[2].mxu1  ;;  %v474_v30 = vld [vmem:[#allocation2 + $0x48] sm:$0xff] }
 0x166   : > { %v455_v37 = vadd.f32 %v1402_v27, %v438_v29  ;;  %v439_v38 = vmul.f32 %v1397_v25, %v395_v34  ;;  %v833_v39 = vpop.f32.mrb[3].mxu0  ;;  %v461_v40 = vadd.f32 %v1402_v27, %v444_v31  ;;  %v445_v41 = vmul.f32 %v1397_v25, %v419_v36  ;;  %v845_v42 = vpop.f32.mrb[3].mxu1 }
 0x168   : > { %v475_v45 = vsub.f32 %v455_v37, %v465_v33  ;;  %v456_v46 = vadd.f32 %v1402_v27, %v439_v38  ;;  %v481_v47 = vsub.f32 %v461_v40, %v471_v35  ;;  %v462_v48 = vadd.f32 %v1402_v27, %v445_v41 }
 0x16a   : > { %v485_v49 = vmul.f32 0.5, %v475_v45  ;;  %v476_v50 = vsub.f32 %v456_v46, %v466_v43  ;;  %v491_v51 = vmul.f32 0.5, %v481_v47  ;;  %v482_v52 = vsub.f32 %v462_v48, %v472_v44 }
 0x16b   : > { %v400_v53 = vpop.f32.mrb[4].mxu0  ;;  %v424_v54 = vpop.f32.mrb[4].mxu1 }
 0x16c   : > { %v495_v55 = vadd.f32 %v485_v49, %v465_v33  ;;  %v486_v56 = vmul.f32 0.5, %v476_v50  ;;  %v501_v57 = vadd.f32 %v491_v51, %v471_v35  ;;  %v492_v58 = vmul.f32 0.5, %v482_v52  ;;  %v836_v59 = vpop.f32.mrb[5].mxu0  ;;  %v848_v60 = vpop.f32.mrb[5].mxu1  ;;  %v469_v35 = vld [vmem:[#allocation2 + $0x20] sm:$0xff] }
 0x16d   : > { %v440_v61 = vmul.f32 %v1397_v25, %v400_v53  ;;  %v403_v62 = vpop.f32.mrb[6].mxu0  ;;  %v446_v63 = vmul.f32 %v1397_v25, %v424_v54  ;;  %v427_v0 = vpop.f32.mrb[6].mxu1 }
 0x16e   : > { %vm505_vm1 = vcmp.ge.f32.partialorder %v495_v55, 1.0  ;;  %v496_v1 = vadd.f32 %v486_v56, %v466_v43  ;;  %vm511_vm2 = vcmp.ge.f32.partialorder %v501_v57, 1.0  ;;  %v502_v3 = vadd.f32 %v492_v58, %v472_v44  ;;  %v837_v4 = vpop.f32.mrb[7].mxu0  ;;  %v849_v5 = vpop.f32.mrb[7].mxu1  ;;  %v470_v44 = vld [vmem:[#allocation2 + $0x28] sm:$0xff] }
 0x16f   : > { %v515_v6 = vsel %vm505_vm1, 0.0, %v495_v55  ;;  %v749_v7 = vsel %vm505_vm1, 1.0, %v1148_v2  ;;  %v521_v8 = vsel %vm511_vm2, 0.0, %v501_v57  ;;  %v755_v9 = vsel %vm511_vm2, 1.0, %v1148_v2 }
 0x170   : > { %525 = vst [vmem:[#allocation2] sm:$0xff] %v515_v6  ;;  %vm506_vm3 = vcmp.ge.f32.partialorder %v496_v1, 1.0  ;;  %531 = vst [vmem:[#allocation2 + $0x30] sm:$0xff] %v521_v8  ;;  %vm512_vm4 = vcmp.ge.f32.partialorder %v502_v3, 1.0  ;;  %v457_v11 = vadd.f32 %v1402_v27, %v440_v61  ;;  %v441_v12 = vmul.f32 %v1397_v25, %v403_v62 }
 0x171   : > { %v516_v13 = vsel %vm506_vm3, 0.0, %v496_v1  ;;  %v750_v14 = vsel %vm506_vm3, 1.0, %v1148_v2  ;;  %v522_v15 = vsel %vm512_vm4, 0.0, %v502_v3  ;;  %v756_v16 = vsel %vm512_vm4, 1.0, %v1148_v2 }
 0x172   : > { %526 = vst [vmem:[#allocation2 + $0x8] sm:$0xff] %v516_v13  ;;  %v783_v18 = vpack.c.bf16 %v750_v14, %v749_v7  ;;  %532 = vst [vmem:[#allocation2 + $0x38] sm:$0xff] %v522_v15  ;;  %v792_v19 = vpack.c.bf16 %v756_v16, %v755_v9  ;;  %v477_v20 = vsub.f32 %v457_v11, %v467_v10 }
 0x173   : > { %v458_v21 = vadd.f32 %v1402_v27, %v441_v12  ;;  %v463_v23 = vadd.f32 %v1402_v27, %v446_v63  ;;  %v447_v24 = vmul.f32 %v1397_v25, %v427_v0  ;;  %v408_v26 = vpop.f32.mrb[8].mxu0 }
 0x174   : > { %784 = vst [vmem:[%s1355_s8] sm:$0xff] %v783_v18   ;;  %799 = vst [vmem:[%s1355_s8 + $0x18] sm:$0xff] %v792_v19   ;;  %v487_v28 = vmul.f32 0.5, %v477_v20  ;;  %v442_v31 = vmul.f32 %v1397_v25, %v408_v26  ;;  %v840_v32 = vpop.f32.mrb[9].mxu0 }
 0x175   : > { %v478_v29 = vsub.f32 %v458_v21, %v468_v17  ;;  %v483_v33 = vsub.f32 %v463_v23, %v473_v22  ;;  %v464_v34 = vadd.f32 %v1402_v27, %v447_v24  ;;  %v411_v36 = vpop.f32.mrb[10].mxu0 }
 0x176   : > { %v497_v37 = vadd.f32 %v487_v28, %v467_v10  ;;  %v459_v39 = vadd.f32 %v1402_v27, %v442_v31  ;;  %v443_v40 = vmul.f32 %v1397_v25, %v411_v36  ;;  %v841_v41 = vpop.f32.mrb[11].mxu0 }
 0x177   : > { %v488_v38 = vmul.f32 0.5, %v478_v29  ;;  %v493_v42 = vmul.f32 0.5, %v483_v33  ;;  %v484_v43 = vsub.f32 %v464_v34, %v474_v30 }
 0x178   : > { %vm507_vm5 = vcmp.ge.f32.partialorder %v497_v37, 1.0  ;;  %v479_v46 = vsub.f32 %v459_v39, %v469_v35  ;;  %v460_v47 = vadd.f32 %v1402_v27, %v443_v40 }
 0x179   : > { %v498_v45 = vadd.f32 %v488_v38, %v468_v17  ;;  %v517_v48 = vsel %vm507_vm5, 0.0, %v497_v37  ;;  %v503_v49 = vadd.f32 %v493_v42, %v473_v22  ;;  %v494_v50 = vmul.f32 0.5, %v484_v43 }
 0x17a   : > { %527 = vst [vmem:[#allocation2 + $0x10] sm:$0xff] %v517_v48  ;;  %v751_v51 = vsel %vm507_vm5, 1.0, %v1148_v2  ;;  %v489_v25 = vmul.f32 0.5, %v479_v46  ;;  %v480_v52 = vsub.f32 %v460_v47, %v470_v44 }
 0x17b   : > { %vm508_vm6 = vcmp.ge.f32.partialorder %v498_v45, 1.0  ;;  %vm513_vm7 = vcmp.ge.f32.partialorder %v503_v49, 1.0  ;;  %v504_v55 = vadd.f32 %v494_v50, %v474_v30 }
 0x17c   : > { %v518_v53 = vsel %vm508_vm6, 0.0, %v498_v45  ;;  %v752_v54 = vsel %vm508_vm6, 1.0, %v1148_v2  ;;  %v523_v57 = vsel %vm513_vm7, 0.0, %v503_v49  ;;  %v757_v27 = vsel %vm513_vm7, 1.0, %v1148_v2 }
 0x17d   : > { %528 = vst [vmem:[#allocation2 + $0x18] sm:$0xff] %v518_v53  ;;  %v786_v56 = vpack.c.bf16 %v752_v54, %v751_v51  ;;  %v499_v58 = vadd.f32 %v489_v25, %v469_v35  ;;  %533 = vst [vmem:[#allocation2 + $0x40] sm:$0xff] %v523_v57  ;;  %vm514_vm8 = vcmp.ge.f32.partialorder %v504_v55, 1.0  ;;  %v490_v59 = vmul.f32 0.5, %v480_v52 }
 0x17e   : > { %v524_v60 = vsel %vm514_vm8, 0.0, %v504_v55  ;;  %v758_v61 = vsel %vm514_vm8, 1.0, %v1148_v2 }
 0x17f   : > { %797 = vst [vmem:[%s1355_s8 + $0x8] sm:$0xff] %v786_v56   ;;  %vm509_vm9 = vcmp.ge.f32.partialorder %v499_v58, 1.0  ;;  %534 = vst [vmem:[#allocation2 + $0x48] sm:$0xff] %v524_v60  ;;  %v795_v62 = vpack.c.bf16 %v758_v61, %v757_v27  ;;  %v500_v0 = vadd.f32 %v490_v59, %v470_v44 }
 0x180   : > { %v519_v63 = vsel %vm509_vm9, 0.0, %v499_v58  ;;  %v753_v1 = vsel %vm509_vm9, 1.0, %v1148_v2 }
 0x181   : > { %529 = vst [vmem:[#allocation2 + $0x20] sm:$0xff] %v519_v63  ;;  %800 = vst [vmem:[%s1355_s8 + $0x20] sm:$0xff] %v795_v62   ;;  %vm510_vm10 = vcmp.ge.f32.partialorder %v500_v0, 1.0 }
 0x182   : > { %v520_v3 = vsel %vm510_vm10, 0.0, %v500_v0  ;;  %v754_v4 = vsel %vm510_vm10, 1.0, %v1148_v2 }
 0x183   : > { %530 = vst [vmem:[#allocation2 + $0x28] sm:$0xff] %v520_v3  ;;  %v789_v5 = vpack.c.bf16 %v754_v4, %v753_v1 }
 0x185   : > { %798 = vst [vmem:[%s1355_s8 + $0x10] sm:$0xff] %v789_v5  }
 0x186   : > { %1050 = shalt.err (!%p1047_p1)
}
 0x187   : > { %s1051_s29 = scalar_lea.hbm %s1444_s24, 640  ;;  %s1055_s27 = scalar_lea.hbm %s1505_s4, 5120 }
 0x188   : > { %p1052_p2 = scmp.ne.s32.totalorder %s1444_s24, %s1051_s29  ;;  %p1056_p9 = scmp.lt.u32.totalorder %s1444_s24, %s1505_s4 }
 0x189   : > { %p1057_p0 = scmp.lt.u32.totalorder %s1055_s27, %s1051_s29  ;;  %p1059_p8 = scmp.lt.u32.totalorder %s1051_s29, %s1444_s24 }
 0x18a   : > { %p1053_p4 = pnand %p1052_p2, %p1283_p11 }
 0x18b   : > { %p1058_p6 = por %p1057_p0, %p1056_p9 }
 0x18c   : > { %p1054_p5 = pneg %p1053_p4 }
 0x18d   : > { %p1060_p10 = por %p1059_p8, %p1058_p6 }
 0x18f   : > { %p1061_p12 = pnand %p1060_p10, %p1054_p5 }
 0x191   : > { %1064 = shalt.err (!%p1061_p12)
}
 0x192   : > { %s1151_s13 = smov 64   ;;  %s1152_s9 = smov 4  }
 0x193   : > { %879 = dma.vmem_to_hbm [thread:$0]  (%p1283_p11), %s1446_s5, 640, %s1444_s24, %s606_s7, %s1151_s13, %s1151_s13, %s1152_s9  }
 0x194 PF: > { %s1532_s18 = sld [smem:[#allocation13_spill]]  ;;  %p896_p13 = scmp.ge.s32.totalorder %s1139_s22, 2 }
 0x195   : > { %s638_s19 = sand.u32 1, %s1111_s15  }
 0x196   : > { %s639_s12 = scalar_lea.sflag [#allocation5], %s638_s19 }
 0x19a   : > { %p1533_p3 = scmp.ne.s32.totalorder %s1532_s18, 0 }
 0x19c   : > { %p890_p7 = pnand %p896_p13, %p1533_p3 }
 0x19e   : > { %1106 = dma.done.wait (!%p890_p7), %s639_s12, 640  }
 0x19f   : > { %1108 = vsyncadd (!%p890_p7), %s639_s12, 4294966656  ;;  %s21_s22 = sadd.s32 1, %s1139_s22   ;;  %s1534_s18 = sld [smem:[#allocation12_spill]] }
 0x1a0   : > { %p18_p1 = scmp.ge.s32.totalorder %s21_s22, 10   ;;  %s1535_s20 = sld [smem:[#allocation14_spill]] }
 0x1a1   : > { %s1536_s6 = sld [smem:[#allocation15_spill]]  ;;  %s1537_s15 = smov %s1115_s16 }
 0x1a2   : > { %s1538_s16 = smov %s1119_s17  ;;  %s1539_s17 = smov %s1300_s26 }
 0x1a3   : > { %s1540_s19 = smov %s1135_s21  ;;  %20 = sbr.rel (!%p18_p1) target bundleno = 10 (0xa), region = 89 }
 0x1a7   : > { %s1541_s21 = smov %s1536_s6 }
 0x1aa   :  { %644 = vsyncpa [#allocation4], 1 }
 0x1ab   :  { %646 = vsyncpa [#allocation4 + $0x1], 1 }
 0x1ac   :  { %647 = vsyncpa [#allocation7], 1 }
 0x1ad   :  { %648 = vsyncpa [#allocation5], 1 }
 0x1ae   :  { %650 = vsyncpa [#allocation5 + $0x1], 1 }

</bundles_post_ra>
